<compile_context>
chip_gen: v7x
topology: tpu7x:2x2x1
jax: 0.10.0
libtpu: 0.0.40
codegen_flags: <defaults>
</compile_context>

<pallas_src>
import functools

import jax
import jax.numpy as jnp
from jax import lax
from jax.experimental import pallas as pl
from jax.experimental.pallas import tpu as pltpu


# Giles (2010) single-precision erfinv polynomial coefficients.
_ERFINV_CENTRAL = (2.81022636e-08, 3.43273939e-07, -3.5233877e-06,
                   -4.39150654e-06, 0.00021858087, -0.00125372503,
                   -0.00417768164, 0.246640727, 1.50140941)
_ERFINV_TAIL = (-0.000200214257, 0.000100950558, 0.00134934322,
                -0.00367342844, 0.00573950773, -0.0076224613,
                0.00943887047, 1.00167406, 2.83297682)


def _erfinv_f32(x):
    """Single-precision erfinv(x) for x strictly inside (-1, 1)."""
    w = -jnp.log((1.0 - x) * (1.0 + x))
    # Central branch (w < 5).
    wc = w - 2.5
    pc = jnp.float32(_ERFINV_CENTRAL[0])
    for c in _ERFINV_CENTRAL[1:]:
        pc = pc * wc + jnp.float32(c)
    # Tail branch (w >= 5).
    wt = jnp.sqrt(w) - 3.0
    pt = jnp.float32(_ERFINV_TAIL[0])
    for c in _ERFINV_TAIL[1:]:
        pt = pt * wt + jnp.float32(c)
    return jnp.where(w < 5.0, pc, pt) * x


def _gaussian_noise_kernel(seed_ref, x_ref, o_ref, *, sigma, n_cols, block_rows):
    """out = x * (1 + sigma * z), z ~ N(0,1) keyed on (seed, global element idx)."""
    tr, tc = x_ref.shape
    i = pl.program_id(0)

    # Global element index of every element in this block -> noise does not
    # depend on tiling or on which TensorCore processed the block.
    ri = lax.broadcasted_iota(jnp.int32, (tr, tc), 0) + i * block_rows
    ci = lax.broadcasted_iota(jnp.int32, (tr, tc), 1)
    idx = lax.bitcast_convert_type(ri * n_cols + ci, jnp.uint32)

    # Counter-based RNG: Weyl step + murmur3 finalizer (good avalanche, VPU-only).
    h = idx * jnp.uint32(0x9E3779B9) + seed_ref[0]
    h = h ^ (h >> 16)
    h = h * jnp.uint32(0x85EBCA6B)
    h = h ^ (h >> 13)
    h = h * jnp.uint32(0xC2B2AE35)
    h = h ^ (h >> 16)

    # 23 random mantissa bits -> f in [1, 2) -> u uniform, strictly inside (-1, 1).
    fbits = (h >> 9) | jnp.uint32(0x3F800000)
    f = lax.bitcast_convert_type(fbits, jnp.float32)
    u = (f - 1.5) * jnp.float32(2.0 - 2.0 ** -21)

    # Inverse-CDF: z = sqrt(2) * erfinv(u)  ~  N(0, 1).
    z = jnp.float32(1.4142135623730951) * _erfinv_f32(u)

    x = x_ref[...]
    o_ref[...] = (x * (1.0 + jnp.float32(sigma) * z)).astype(o_ref.dtype)


def gaussian_noise(x, seed, *, sigma=0.1, training=True, is_relative_detach=True,
                   block_rows=None):
    """Pallas implementation of GaussianNoise.forward.

    x: any-shaped float array (NCHW in the reference usage).
    seed: int (or int32 scalar); vary it per training step for fresh noise.
    block_rows: optional override of the row-block size (testing / tuning).
    """
    # is_relative_detach only affects gradients; the forward value is identical.
    if (not training) or sigma == 0:
        return x

    orig_shape = x.shape
    dtype = x.dtype
    n = x.size
    if n == 0:
        return x

    # Lane-dense 2-D view.  For typical activation sizes (multiple of 128) the
    # reshapes are free row-major views and no padding is needed.
    lane_w = None
    for w in (1024, 512, 256, 128):
        if n % w == 0:
            lane_w = w
            break
    if lane_w is None:           # awkward size: minimal pad (costs one extra pass)
        lane_w = 128
        pad = (-n) % lane_w
    else:
        pad = 0

    flat = x.reshape(-1)
    if pad:
        flat = jnp.pad(flat, (0, pad))
    rows = (n + pad) // lane_w
    x2d = flat.reshape(rows, lane_w)

    # ~1 MiB blocks: large enough to hit the HBM roofline, small enough that the
    # double-buffered in/out blocks plus elementwise temporaries fit the scoped
    # VMEM budget on every TPU generation (including v7x's 64 MiB physical VMEM).
    itemsize = jnp.dtype(dtype).itemsize
    if block_rows is None:
        block_rows = max(8, (1 << 20) // (lane_w * itemsize))
    block_rows = max(8, (int(block_rows) // 8) * 8)
    tile_r = rows if (rows <= block_rows or rows < 8) else block_rows
    grid = (pl.cdiv(rows, tile_r),)

    seed_arr = jnp.asarray([seed]).astype(jnp.uint32)

    out2d = pl.pallas_call(
        functools.partial(_gaussian_noise_kernel, sigma=float(sigma),
                          n_cols=lane_w, block_rows=tile_r),
        out_shape=jax.ShapeDtypeStruct((rows, lane_w), dtype),
        grid=grid,
        in_specs=[
            pl.BlockSpec(memory_space=pltpu.MemorySpace.SMEM),      # seed scalar
            pl.BlockSpec((tile_r, lane_w), lambda i: (i, 0)),       # x block
        ],
        out_specs=pl.BlockSpec((tile_r, lane_w), lambda i: (i, 0)),
        compiler_params=pltpu.CompilerParams(
            dimension_semantics=("parallel",),        # lets v7x use both TCs
            vmem_limit_bytes=32 * 1024 * 1024,
        ),
    )(seed_arr, x2d)

    if pad:
        return out2d.reshape(-1)[:n].reshape(orig_shape)
    return out2d.reshape(orig_shape)


if __name__ == "__main__":
    key = jax.random.PRNGKey(0)
    # NCHW, matching PyTorch conv-style activations.
    x = jax.random.normal(key, (2, 4, 16, 16), dtype=jnp.float32)

    y = jax.block_until_ready(gaussian_noise(x, seed=42, sigma=0.1, training=True))
    assert y.shape == x.shape and y.dtype == x.dtype
    assert bool(jnp.all(jnp.isfinite(y)))

    # Noise is relative: z_hat = (y - x) / (sigma * x) should look like N(0, 1).
    mask = jnp.abs(x) > 1e-3
    z_hat = jnp.where(mask, (y - x) / (0.1 * x), 0.0)
    cnt = jnp.maximum(jnp.sum(mask), 1).astype(jnp.float32)
    mean = jnp.sum(z_hat) / cnt
    std = jnp.sqrt(jnp.sum(jnp.where(mask, (z_hat - mean) ** 2, 0.0)) / cnt)
    assert abs(float(mean)) < 0.2, float(mean)
    assert 0.7 < float(std) < 1.3, float(std)

    # Eval mode / sigma == 0 is the identity.
    y_eval = jax.block_until_ready(gaussian_noise(x, seed=42, sigma=0.1, training=False))
    assert bool(jnp.all(y_eval == x))

    # Noise depends only on (seed, element index): re-tiling must not change it.
    x2 = jax.random.normal(jax.random.PRNGKey(1), (4, 8, 32, 32), dtype=jnp.float32)
    y_a = jax.block_until_ready(gaussian_noise(x2, seed=7, sigma=0.1, block_rows=8))
    y_b = jax.block_until_ready(gaussian_noise(x2, seed=7, sigma=0.1))
    assert bool(jnp.allclose(y_a, y_b, rtol=1e-5, atol=1e-6))

    print("KERNEL_OK")
</pallas_src>

<mosaic_0001>
module attributes {stable_mosaic.version = 11 : i64} {
  func.func @_gaussian_noise_kernel(%arg0: i32, %arg1: memref<1xi32, #tpu.memory_space<smem>>, %arg2: memref<2x1024xf32, #tpu.memory_space<vmem>>, %arg3: memref<2x1024xf32, #tpu.memory_space<vmem>>) attributes {dimension_semantics = [#tpu.dimension_semantics<parallel>], iteration_bounds = array<i64: 1>, scalar_prefetch = 0 : i64, scratch_operands = 0 : i64, tpu.core_type = #tpu.core_type<tc>, window_params = [{transform_indices = @transform_0, window_bounds = array<i64: 1>}, {transform_indices = @transform_1, window_bounds = array<i64: 2, 1024>}, {transform_indices = @transform_2, window_bounds = array<i64: 2, 1024>}]} {
    %0 = tpu.iota {dimensions = array<i32: 0>} : vector<2x1024xi32>
    %c2_i32 = arith.constant 2 : i32
    %1 = arith.muli %arg0, %c2_i32 : i32
    %2 = vector.broadcast %1 : i32 to vector<2x1024xi32>
    %3 = arith.addi %0, %2 : vector<2x1024xi32>
    %4 = tpu.iota {dimensions = array<i32: 1>} : vector<2x1024xi32>
    %c1024_i32 = arith.constant 1024 : i32
    %5 = vector.broadcast %c1024_i32 : i32 to vector<2x1024xi32>
    %6 = arith.muli %3, %5 : vector<2x1024xi32>
    %7 = arith.addi %6, %4 : vector<2x1024xi32>
    %8 = tpu.bitcast %7 : vector<2x1024xi32> -> vector<2x1024xi32>
    %c-1640531527_i32 = arith.constant -1640531527 : i32
    %9 = vector.broadcast %c-1640531527_i32 : i32 to vector<2x1024xi32>
    %10 = arith.muli %8, %9 : vector<2x1024xi32>
    %c0 = arith.constant 0 : index
    %11 = memref.load %arg1[%c0] : memref<1xi32, #tpu.memory_space<smem>>
    %12 = vector.broadcast %11 : i32 to vector<2x1024xi32>
    %13 = arith.addi %10, %12 : vector<2x1024xi32>
    %c16_i32 = arith.constant 16 : i32
    %14 = vector.broadcast %c16_i32 : i32 to vector<2x1024xi32>
    %15 = arith.shrui %13, %14 : vector<2x1024xi32>
    %16 = arith.xori %13, %15 : vector<2x1024xi32>
    %c-2048144789_i32 = arith.constant -2048144789 : i32
    %17 = vector.broadcast %c-2048144789_i32 : i32 to vector<2x1024xi32>
    %18 = arith.muli %16, %17 : vector<2x1024xi32>
    %c13_i32 = arith.constant 13 : i32
    %19 = vector.broadcast %c13_i32 : i32 to vector<2x1024xi32>
    %20 = arith.shrui %18, %19 : vector<2x1024xi32>
    %21 = arith.xori %18, %20 : vector<2x1024xi32>
    %c-1028477387_i32 = arith.constant -1028477387 : i32
    %22 = vector.broadcast %c-1028477387_i32 : i32 to vector<2x1024xi32>
    %23 = arith.muli %21, %22 : vector<2x1024xi32>
    %c16_i32_0 = arith.constant 16 : i32
    %24 = vector.broadcast %c16_i32_0 : i32 to vector<2x1024xi32>
    %25 = arith.shrui %23, %24 : vector<2x1024xi32>
    %26 = arith.xori %23, %25 : vector<2x1024xi32>
    %c9_i32 = arith.constant 9 : i32
    %27 = vector.broadcast %c9_i32 : i32 to vector<2x1024xi32>
    %28 = arith.shrui %26, %27 : vector<2x1024xi32>
    %c1065353216_i32 = arith.constant 1065353216 : i32
    %29 = vector.broadcast %c1065353216_i32 : i32 to vector<2x1024xi32>
    %30 = arith.ori %28, %29 : vector<2x1024xi32>
    %31 = tpu.bitcast %30 : vector<2x1024xi32> -> vector<2x1024xf32>
    %cst = arith.constant 1.500000e+00 : f32
    %32 = vector.broadcast %cst : f32 to vector<2x1024xf32>
    %33 = arith.subf %31, %32 : vector<2x1024xf32>
    %cst_1 = arith.constant 1.99999952 : f32
    %34 = vector.broadcast %cst_1 : f32 to vector<2x1024xf32>
    %35 = arith.mulf %33, %34 : vector<2x1024xf32>
    %cst_2 = arith.constant 1.000000e+00 : f32
    %36 = vector.broadcast %cst_2 : f32 to vector<2x1024xf32>
    %37 = arith.subf %36, %35 : vector<2x1024xf32>
    %cst_3 = arith.constant 1.000000e+00 : f32
    %38 = vector.broadcast %cst_3 : f32 to vector<2x1024xf32>
    %39 = arith.addf %38, %35 : vector<2x1024xf32>
    %40 = arith.mulf %37, %39 : vector<2x1024xf32>
    %41 = math.log %40 : vector<2x1024xf32>
    %cst_4 = arith.constant 0.000000e+00 : f32
    %42 = vector.broadcast %cst_4 : f32 to vector<2x1024xf32>
    %43 = arith.subf %42, %41 : vector<2x1024xf32>
    %cst_5 = arith.constant 2.500000e+00 : f32
    %44 = vector.broadcast %cst_5 : f32 to vector<2x1024xf32>
    %45 = arith.subf %43, %44 : vector<2x1024xf32>
    %cst_6 = arith.constant 2.81022636E-8 : f32
    %46 = vector.broadcast %cst_6 : f32 to vector<2x1024xf32>
    %47 = arith.mulf %46, %45 : vector<2x1024xf32>
    %cst_7 = arith.constant 3.43273939E-7 : f32
    %48 = vector.broadcast %cst_7 : f32 to vector<2x1024xf32>
    %49 = arith.addf %47, %48 : vector<2x1024xf32>
    %50 = arith.mulf %49, %45 : vector<2x1024xf32>
    %cst_8 = arith.constant -3.5233877E-6 : f32
    %51 = vector.broadcast %cst_8 : f32 to vector<2x1024xf32>
    %52 = arith.addf %50, %51 : vector<2x1024xf32>
    %53 = arith.mulf %52, %45 : vector<2x1024xf32>
    %cst_9 = arith.constant -4.39150654E-6 : f32
    %54 = vector.broadcast %cst_9 : f32 to vector<2x1024xf32>
    %55 = arith.addf %53, %54 : vector<2x1024xf32>
    %56 = arith.mulf %55, %45 : vector<2x1024xf32>
    %cst_10 = arith.constant 2.1858087E-4 : f32
    %57 = vector.broadcast %cst_10 : f32 to vector<2x1024xf32>
    %58 = arith.addf %56, %57 : vector<2x1024xf32>
    %59 = arith.mulf %58, %45 : vector<2x1024xf32>
    %cst_11 = arith.constant -0.00125372503 : f32
    %60 = vector.broadcast %cst_11 : f32 to vector<2x1024xf32>
    %61 = arith.addf %59, %60 : vector<2x1024xf32>
    %62 = arith.mulf %61, %45 : vector<2x1024xf32>
    %cst_12 = arith.constant -0.00417768164 : f32
    %63 = vector.broadcast %cst_12 : f32 to vector<2x1024xf32>
    %64 = arith.addf %62, %63 : vector<2x1024xf32>
    %65 = arith.mulf %64, %45 : vector<2x1024xf32>
    %cst_13 = arith.constant 0.246640727 : f32
    %66 = vector.broadcast %cst_13 : f32 to vector<2x1024xf32>
    %67 = arith.addf %65, %66 : vector<2x1024xf32>
    %68 = arith.mulf %67, %45 : vector<2x1024xf32>
    %cst_14 = arith.constant 1.50140941 : f32
    %69 = vector.broadcast %cst_14 : f32 to vector<2x1024xf32>
    %70 = arith.addf %68, %69 : vector<2x1024xf32>
    %71 = math.sqrt %43 : vector<2x1024xf32>
    %cst_15 = arith.constant 3.000000e+00 : f32
    %72 = vector.broadcast %cst_15 : f32 to vector<2x1024xf32>
    %73 = arith.subf %71, %72 : vector<2x1024xf32>
    %cst_16 = arith.constant -2.00214257E-4 : f32
    %74 = vector.broadcast %cst_16 : f32 to vector<2x1024xf32>
    %75 = arith.mulf %74, %73 : vector<2x1024xf32>
    %cst_17 = arith.constant 1.00950558E-4 : f32
    %76 = vector.broadcast %cst_17 : f32 to vector<2x1024xf32>
    %77 = arith.addf %75, %76 : vector<2x1024xf32>
    %78 = arith.mulf %77, %73 : vector<2x1024xf32>
    %cst_18 = arith.constant 0.00134934322 : f32
    %79 = vector.broadcast %cst_18 : f32 to vector<2x1024xf32>
    %80 = arith.addf %78, %79 : vector<2x1024xf32>
    %81 = arith.mulf %80, %73 : vector<2x1024xf32>
    %cst_19 = arith.constant -0.00367342844 : f32
    %82 = vector.broadcast %cst_19 : f32 to vector<2x1024xf32>
    %83 = arith.addf %81, %82 : vector<2x1024xf32>
    %84 = arith.mulf %83, %73 : vector<2x1024xf32>
    %cst_20 = arith.constant 0.00573950773 : f32
    %85 = vector.broadcast %cst_20 : f32 to vector<2x1024xf32>
    %86 = arith.addf %84, %85 : vector<2x1024xf32>
    %87 = arith.mulf %86, %73 : vector<2x1024xf32>
    %cst_21 = arith.constant -0.0076224613 : f32
    %88 = vector.broadcast %cst_21 : f32 to vector<2x1024xf32>
    %89 = arith.addf %87, %88 : vector<2x1024xf32>
    %90 = arith.mulf %89, %73 : vector<2x1024xf32>
    %cst_22 = arith.constant 0.00943887047 : f32
    %91 = vector.broadcast %cst_22 : f32 to vector<2x1024xf32>
    %92 = arith.addf %90, %91 : vector<2x1024xf32>
    %93 = arith.mulf %92, %73 : vector<2x1024xf32>
    %cst_23 = arith.constant 1.00167406 : f32
    %94 = vector.broadcast %cst_23 : f32 to vector<2x1024xf32>
    %95 = arith.addf %93, %94 : vector<2x1024xf32>
    %96 = arith.mulf %95, %73 : vector<2x1024xf32>
    %cst_24 = arith.constant 2.83297682 : f32
    %97 = vector.broadcast %cst_24 : f32 to vector<2x1024xf32>
    %98 = arith.addf %96, %97 : vector<2x1024xf32>
    %cst_25 = arith.constant 5.000000e+00 : f32
    %99 = vector.broadcast %cst_25 : f32 to vector<2x1024xf32>
    %100 = arith.cmpf olt, %43, %99 : vector<2x1024xf32>
    %101 = arith.select %100, %70, %98 : vector<2x1024xi1>, vector<2x1024xf32>
    %102 = arith.mulf %101, %35 : vector<2x1024xf32>
    %cst_26 = arith.constant 1.41421354 : f32
    %103 = vector.broadcast %cst_26 : f32 to vector<2x1024xf32>
    %104 = arith.mulf %103, %102 : vector<2x1024xf32>
    %c0_27 = arith.constant 0 : index
    %c0_28 = arith.constant 0 : index
    %105 = vector.load %arg2[%c0_27, %c0_28] : memref<2x1024xf32, #tpu.memory_space<vmem>>, vector<2x1024xf32>
    %cst_29 = arith.constant 1.000000e-01 : f32
    %106 = vector.broadcast %cst_29 : f32 to vector<2x1024xf32>
    %107 = arith.mulf %106, %104 : vector<2x1024xf32>
    %cst_30 = arith.constant 1.000000e+00 : f32
    %108 = vector.broadcast %cst_30 : f32 to vector<2x1024xf32>
    %109 = arith.addf %108, %107 : vector<2x1024xf32>
    %110 = arith.mulf %105, %109 : vector<2x1024xf32>
    %c0_31 = arith.constant 0 : index
    %c0_32 = arith.constant 0 : index
    %111 = vector.load %arg3[%c0_31, %c0_32] : memref<2x1024xf32, #tpu.memory_space<vmem>>, vector<2x1024xf32>
    tpu.vector_store %arg3[%c0_31, %c0_32], %110 {strides = array<i32>} : memref<2x1024xf32, #tpu.memory_space<vmem>>, vector<2x1024xf32>,
    return
  }
  func.func @transform_0(%arg0: i32) -> i32 {
    %c0_i32 = arith.constant 0 : i32
    %c0_i32_0 = arith.constant 0 : i32
    return %c0_i32 : i32
  }
  func.func @transform_1(%arg0: i32) -> (i32, i32) {
    %c0_i32 = arith.constant 0 : i32
    %c0_i32_0 = arith.constant 0 : i32
    return %arg0, %c0_i32 : i32, i32
  }
  func.func @transform_2(%arg0: i32) -> (i32, i32) {
    %c0_i32 = arith.constant 0 : i32
    %c0_i32_0 = arith.constant 0 : i32
    return %arg0, %c0_i32 : i32, i32
  }
}

</mosaic_0001>

<bundles_post_ra>
// kernel: tpu_custom_call.1
= control target key start
LH: loop header
LB: loop body
LE: loop exit
PB: predicated region body
PF: predicated region fallthrough
CT: control target
= control target key end

     0   :  { %8 = vsyncpa [#allocation4], 0  ;;  %s1171_s0 = inlined_call_operand.<no memory space> [shape: u32[1], index: 0, kind: input, shape index: {}]   ;;  %s1172_s1 = inlined_call_operand.hbm [shape: f32[2,1024], index: 1, kind: input, shape index: {}]   ;;  %s1173_s2 = inlined_call_operand.hbm [shape: f32[2,1024], index: 2, kind: output, shape index: {}]  }
   0x1   :  { %9 = vsyncpa [#allocation5], 0  ;;  %s766_s9 = smov [#allocation3]   ;;  %s718_s13 = scalar_lea.hbm %s1172_s1, 256 }
   0x2   :  { %s18_s10 = sshll.u32 %s766_s9, 4  ;;  %p719_p0 = scmp.ne.s32.totalorder %s1172_s1, %s718_s13  ;;  %s19_s10 = int_to_ptr.vmem [resolvable:$true] %s18_s10 }
   0x3   :  { %p722_p1 = scmp.lt.u32.totalorder %s718_s13, %s1172_s1 }
   0x5   :  { %p724_p2 = pnand %p722_p1, %p719_p0 }
   0x7   :  { %727 = shalt.err (!%p724_p2)
}
   0x8   :  { %s728_s18 = scalar_lea.vmem %s19_s10, 256  ;;  %p733_p4 = scmp.lt.s32.totalorder %s19_s10, %s19_s10 }
   0x9   :  { %p729_p3 = scmp.ne.s32.totalorder %s19_s10, %s728_s18  ;;  %p734_p5 = scmp.lt.s32.totalorder %s728_s18, %s728_s18 }
   0xb   :  { %p735_p6 = por %p734_p5, %p733_p4 }
   0xd   :  { %p736_p7 = pnand %p735_p6, %p729_p3 }
   0xf   :  { %739 = shalt.err (!%p736_p7)
}
  0x10   :  { %21 = dma.hbm_to_vmem [thread:$0]  %s1172_s1, 256, %s19_s10, [#allocation4]  }
  0x11   :  { %762 = dma.done.wait [#allocation4], 256  }
  0x12   :  { %763 = vsyncadd [#allocation4], 4294967040  ;;  %v25_v0 = vlaneseq  ;;  %v57_v11 = vstv %s1171_s0  ;;  %s768_s0 = smov [#allocation6]  }
  0x13   :  { %s650_s1 = sshll.u32 %s768_s0, 4  ;;  %s651_s1 = int_to_ptr.vmem [resolvable:$true] %s650_s1 }
  0x14   :  { %v796_v1 = vshrl.u32 %v25_v0, 7  ;;  %v31_v2 = vand.u32 127, %v25_v0  ;;  %s740_s23 = scalar_lea.vmem %s651_s1, 256  ;;  %p745_p9 = scmp.lt.s32.totalorder %s651_s1, %s651_s1 }
  0x15   :  { %p741_p8 = scmp.ne.s32.totalorder %s651_s1, %s740_s23  ;;  %p746_p10 = scmp.lt.s32.totalorder %s740_s23, %s740_s23 }
  0x16   :  { %v32_v3 = vadd.s32 128, %v31_v2  ;;  %v33_v4 = vadd.s32 256, %v31_v2  ;;  %v34_v5 = vadd.s32 384, %v31_v2  ;;  %v35_v6 = vadd.s32 512, %v31_v2 }
  0x17   :  { %v36_v7 = vadd.s32 640, %v31_v2  ;;  %v37_v8 = vadd.s32 768, %v31_v2  ;;  %v38_v9 = vadd.s32 896, %v31_v2  ;;  %v39_v10 = vmul.u32 1024, %v796_v1  ;;  %p747_p11 = por %p746_p10, %p745_p9 }
  0x19   :  { %v40_v12 = vadd.s32 %v39_v10, %v31_v2  ;;  %v41_v13 = vadd.s32 %v39_v10, %v32_v3  ;;  %v42_v14 = vadd.s32 %v39_v10, %v33_v4  ;;  %v43_v15 = vadd.s32 %v39_v10, %v34_v5  ;;  %p748_p12 = pnand %p747_p11, %p741_p8 }
  0x1a   :  { %v44_v16 = vadd.s32 %v39_v10, %v35_v6  ;;  %v45_v17 = vadd.s32 %v39_v10, %v36_v7  ;;  %v46_v18 = vadd.s32 %v39_v10, %v37_v8  ;;  %v47_v19 = vadd.s32 %v39_v10, %v38_v9 }
  0x1b   :  { %v48_v20 = vmul.u32 2654435769, %v40_v12  ;;  %v49_v21 = vmul.u32 2654435769, %v41_v13 }
  0x1c   :  { %v50_v22 = vmul.u32 2654435769, %v42_v14  ;;  %v51_v23 = vmul.u32 2654435769, %v43_v15 }
  0x1d   :  { %v52_v24 = vmul.u32 2654435769, %v44_v16  ;;  %v53_v25 = vmul.u32 2654435769, %v45_v17  ;;  %v58_v26 = vadd.s32 %v57_v11, %v48_v20  ;;  %v59_v27 = vadd.s32 %v57_v11, %v49_v21 }
  0x1e   :  { %v54_v28 = vmul.u32 2654435769, %v46_v18  ;;  %v55_v29 = vmul.u32 2654435769, %v47_v19  ;;  %v60_v30 = vadd.s32 %v57_v11, %v50_v22  ;;  %v61_v31 = vadd.s32 %v57_v11, %v51_v23 }
  0x1f   :  { %v62_v32 = vadd.s32 %v57_v11, %v52_v24  ;;  %v63_v33 = vadd.s32 %v57_v11, %v53_v25  ;;  %v66_v34 = vshrl.u32 %v58_v26, 16  ;;  %v67_v35 = vshrl.u32 %v59_v27, 16 }
  0x20   :  { %v64_v36 = vadd.s32 %v57_v11, %v54_v28  ;;  %v65_v37 = vadd.s32 %v57_v11, %v55_v29  ;;  %v68_v38 = vshrl.u32 %v60_v30, 16  ;;  %v69_v39 = vshrl.u32 %v61_v31, 16 }
  0x21   :  { %v70_v40 = vshrl.u32 %v62_v32, 16  ;;  %v71_v41 = vshrl.u32 %v63_v33, 16  ;;  %v74_v42 = vxor.u32 %v66_v34, %v58_v26  ;;  %v75_v43 = vxor.u32 %v67_v35, %v59_v27 }
  0x22   :  { %v72_v44 = vshrl.u32 %v64_v36, 16  ;;  %v73_v45 = vshrl.u32 %v65_v37, 16  ;;  %v76_v46 = vxor.u32 %v68_v38, %v60_v30  ;;  %v77_v47 = vxor.u32 %v69_v39, %v61_v31 }
  0x23   :  { %v78_v48 = vxor.u32 %v70_v40, %v62_v32  ;;  %v79_v49 = vxor.u32 %v71_v41, %v63_v33  ;;  %v82_v50 = vmul.u32 2246822507, %v74_v42  ;;  %v83_v51 = vmul.u32 2246822507, %v75_v43 }
  0x24   :  { %v80_v52 = vxor.u32 %v72_v44, %v64_v36  ;;  %v81_v53 = vxor.u32 %v73_v45, %v65_v37  ;;  %v84_v54 = vmul.u32 2246822507, %v76_v46  ;;  %v85_v55 = vmul.u32 2246822507, %v77_v47 }
  0x25   :  { %v86_v56 = vmul.u32 2246822507, %v78_v48  ;;  %v87_v57 = vmul.u32 2246822507, %v79_v49  ;;  %v90_v58 = vshrl.u32 %v82_v50, 13  ;;  %v91_v59 = vshrl.u32 %v83_v51, 13 }
  0x26   :  { %v88_v60 = vmul.u32 2246822507, %v80_v52  ;;  %v89_v61 = vmul.u32 2246822507, %v81_v53  ;;  %v92_v62 = vshrl.u32 %v84_v54, 13  ;;  %v93_v63 = vshrl.u32 %v85_v55, 13 }
  0x27   :  { %v94_v0 = vshrl.u32 %v86_v56, 13  ;;  %v95_v2 = vshrl.u32 %v87_v57, 13  ;;  %v98_v3 = vxor.u32 %v90_v58, %v82_v50  ;;  %v99_v4 = vxor.u32 %v91_v59, %v83_v51 }
  0x28   :  { %v96_v5 = vshrl.u32 %v88_v60, 13  ;;  %v97_v6 = vshrl.u32 %v89_v61, 13  ;;  %v100_v7 = vxor.u32 %v92_v62, %v84_v54  ;;  %v101_v8 = vxor.u32 %v93_v63, %v85_v55 }
  0x29   :  { %v102_v9 = vxor.u32 %v94_v0, %v86_v56  ;;  %v103_v10 = vxor.u32 %v95_v2, %v87_v57  ;;  %v106_v11 = vmul.u32 3266489909, %v98_v3  ;;  %v107_v12 = vmul.u32 3266489909, %v99_v4 }
  0x2a   :  { %v104_v13 = vxor.u32 %v96_v5, %v88_v60  ;;  %v105_v14 = vxor.u32 %v97_v6, %v89_v61  ;;  %v108_v15 = vmul.u32 3266489909, %v100_v7  ;;  %v109_v16 = vmul.u32 3266489909, %v101_v8 }
  0x2b   :  { %v110_v17 = vmul.u32 3266489909, %v102_v9  ;;  %v111_v18 = vmul.u32 3266489909, %v103_v10  ;;  %v114_v19 = vshrl.u32 %v106_v11, 16  ;;  %v115_v20 = vshrl.u32 %v107_v12, 16 }
  0x2c   :  { %v112_v21 = vmul.u32 3266489909, %v104_v13  ;;  %v113_v22 = vmul.u32 3266489909, %v105_v14  ;;  %v116_v23 = vshrl.u32 %v108_v15, 16  ;;  %v117_v24 = vshrl.u32 %v109_v16, 16 }
  0x2d   :  { %v118_v25 = vshrl.u32 %v110_v17, 16  ;;  %v119_v26 = vshrl.u32 %v111_v18, 16  ;;  %v122_v27 = vxor.u32 %v114_v19, %v106_v11  ;;  %v123_v28 = vxor.u32 %v115_v20, %v107_v12 }
  0x2e   :  { %v120_v29 = vshrl.u32 %v112_v21, 16  ;;  %v121_v30 = vshrl.u32 %v113_v22, 16  ;;  %v124_v31 = vxor.u32 %v116_v23, %v108_v15  ;;  %v125_v32 = vxor.u32 %v117_v24, %v109_v16 }
  0x2f   :  { %v126_v33 = vxor.u32 %v118_v25, %v110_v17  ;;  %v127_v34 = vxor.u32 %v119_v26, %v111_v18  ;;  %v130_v35 = vshrl.u32 %v122_v27, 9  ;;  %v131_v36 = vshrl.u32 %v123_v28, 9 }
  0x30   :  { %v128_v37 = vxor.u32 %v120_v29, %v112_v21  ;;  %v129_v38 = vxor.u32 %v121_v30, %v113_v22  ;;  %v132_v39 = vshrl.u32 %v124_v31, 9  ;;  %v133_v40 = vshrl.u32 %v125_v32, 9 }
  0x31   :  { %v134_v41 = vshrl.u32 %v126_v33, 9  ;;  %v135_v42 = vshrl.u32 %v127_v34, 9  ;;  %v138_v43 = vor.u32 1065353216, %v130_v35  ;;  %v139_v44 = vor.u32 1065353216, %v131_v36 }
  0x32   :  { %v136_v45 = vshrl.u32 %v128_v37, 9  ;;  %v137_v46 = vshrl.u32 %v129_v38, 9  ;;  %v140_v47 = vor.u32 1065353216, %v132_v39  ;;  %v141_v48 = vor.u32 1065353216, %v133_v40 }
  0x33   :  { %v142_v49 = vor.u32 1065353216, %v134_v41  ;;  %v143_v50 = vor.u32 1065353216, %v135_v42  ;;  %v659_v51 = vadd.f32 -1.5, %v138_v43  ;;  %v660_v52 = vadd.f32 -1.5, %v139_v44 }
  0x34   :  { %v144_v53 = vor.u32 1065353216, %v136_v45  ;;  %v145_v54 = vor.u32 1065353216, %v137_v46  ;;  %v661_v55 = vadd.f32 -1.5, %v140_v47  ;;  %v662_v56 = vadd.f32 -1.5, %v141_v48 }
  0x35   :  { %v663_v57 = vadd.f32 -1.5, %v142_v49  ;;  %v664_v58 = vadd.f32 -1.5, %v143_v50  ;;  %v802_v59 = vmul.f32 1.9999995, %v659_v51  ;;  %v804_v60 = vmul.f32 1.9999995, %v660_v52 }
  0x36   :  { %v665_v61 = vadd.f32 -1.5, %v144_v53  ;;  %v666_v62 = vadd.f32 -1.5, %v145_v54  ;;  %v806_v63 = vmul.f32 1.9999995, %v661_v55  ;;  %v808_v0 = vmul.f32 1.9999995, %v662_v56 }
  0x37   :  { %v810_v2 = vmul.f32 1.9999995, %v663_v57  ;;  %v812_v3 = vmul.f32 1.9999995, %v664_v58  ;;  %v170_v5 = vsub.f32 1.0, %v802_v59  ;;  %v171_v6 = vsub.f32 1.0, %v804_v60 }
  0x38   :  { %v814_v4 = vmul.f32 1.9999995, %v665_v61  ;;  %v172_v7 = vsub.f32 1.0, %v806_v63  ;;  %v819_v8 = vmul.f32 1.9999995, %v666_v62  ;;  %v173_v9 = vsub.f32 1.0, %v808_v0 }
  0x39   :  { %v178_v10 = vadd.f32 1.0, %v802_v59  ;;  %v179_v11 = vadd.f32 1.0, %v804_v60  ;;  %v174_v12 = vsub.f32 1.0, %v810_v2  ;;  %v180_v13 = vadd.f32 1.0, %v806_v63 }
  0x3a   :  { %v181_v14 = vadd.f32 1.0, %v808_v0  ;;  %v175_v15 = vsub.f32 1.0, %v812_v3  ;;  %v176_v16 = vsub.f32 1.0, %v814_v4  ;;  %v182_v17 = vadd.f32 1.0, %v810_v2 }
  0x3b   :  { %v183_v18 = vadd.f32 1.0, %v812_v3  ;;  %v184_v19 = vadd.f32 1.0, %v814_v4  ;;  %v186_v20 = vmul.f32 %v178_v10, %v170_v5  ;;  %v187_v21 = vmul.f32 %v179_v11, %v171_v6 }
  0x3c   :  { %v188_v22 = vmul.f32 %v180_v13, %v172_v7  ;;  %v177_v23 = vsub.f32 1.0, %v819_v8  ;;  %v185_v24 = vadd.f32 1.0, %v819_v8  ;;  %v189_v25 = vmul.f32 %v181_v14, %v173_v9 }
  0x3d   :  { %v190_v26 = vmul.f32 %v182_v17, %v174_v12  ;;  %686 = vlog2.f32 %v186_v20  ;;  %v191_v27 = vmul.f32 %v183_v18, %v175_v15  ;;  %v192_v28 = vmul.f32 %v184_v19, %v176_v16 }
  0x3e   :  { %688 = vlog2.f32 %v187_v21  ;;  %v193_v29 = vmul.f32 %v185_v24, %v177_v23 }
  0x3f   :  { %690 = vlog2.f32 %v188_v22 }
  0x40   :  { %692 = vlog2.f32 %v189_v25 }
  0x41   :  { %694 = vlog2.f32 %v190_v26 }
  0x42   :  { %696 = vlog2.f32 %v191_v27 }
  0x43   :  { %698 = vlog2.f32 %v192_v28 }
  0x44   :  { %700 = vlog2.f32 %v193_v29 }
  0x47   :  { %v687_v30 = vpop.eup %686 }
  0x48   :  { %v689_v31 = vpop.eup %688  ;;  %v195_v32 = vmul.f32 0.6931472, %v687_v30 }
  0x49   :  { %v691_v33 = vpop.eup %690  ;;  %v197_v34 = vmul.f32 0.6931472, %v689_v31 }
  0x4a   :  { %v693_v35 = vpop.eup %692  ;;  %v199_v36 = vmul.f32 0.6931472, %v691_v33  ;;  %v834_v37 = vsub.f32 0.0, %v195_v32 }
  0x4b   :  { %v695_v38 = vpop.eup %694  ;;  %v201_v39 = vmul.f32 0.6931472, %v693_v35  ;;  %v836_v40 = vsub.f32 0.0, %v197_v34 }
  0x4c   :  { %v697_v41 = vpop.eup %696  ;;  %v203_v42 = vmul.f32 0.6931472, %v695_v38  ;;  %v838_v43 = vsub.f32 0.0, %v199_v36  ;;  %v841_v44 = vadd.f32 -2.5, %v834_v37  ;;  %702 = vrsqrt.f32 %v834_v37 }
  0x4d   :  { %v699_v45 = vpop.eup %698  ;;  %v205_v46 = vmul.f32 0.6931472, %v697_v41  ;;  %v843_v47 = vsub.f32 0.0, %v201_v39  ;;  %v846_v48 = vadd.f32 -2.5, %v836_v40  ;;  %vm356_vm0 = vcmp.eq.f32.partialorder %v834_v37, inf }
  0x4e   :  { %v701_v49 = vpop.eup %700  ;;  %v207_v50 = vmul.f32 0.6931472, %v699_v45  ;;  %v849_v51 = vsub.f32 0.0, %v203_v42  ;;  %v852_v52 = vadd.f32 -2.5, %v838_v43  ;;  %v226_v53 = vmul.f32 2.8102264e-08, %v841_v44 }
  0x4f   :  { %v209_v54 = vmul.f32 0.6931472, %v701_v49  ;;  %v855_v55 = vsub.f32 0.0, %v205_v46  ;;  %v858_v56 = vadd.f32 -2.5, %v843_v47  ;;  %v227_v57 = vmul.f32 2.8102264e-08, %v846_v48 }
  0x50   :  { %v861_v58 = vsub.f32 0.0, %v207_v50  ;;  %v864_v61 = vadd.f32 -2.5, %v849_v51  ;;  %v228_v62 = vmul.f32 2.8102264e-08, %v852_v52  ;;  %v234_v5 = vadd.f32 3.4327394e-07, %v226_v53 }
  0x51   :  { %v867_v6 = vsub.f32 0.0, %v209_v54  ;;  %v870_v7 = vadd.f32 -2.5, %v855_v55  ;;  %v229_v9 = vmul.f32 2.8102264e-08, %v858_v56  ;;  %v235_v10 = vadd.f32 3.4327394e-07, %v227_v57 }
  0x52   :  { %v874_v11 = vadd.f32 -2.5, %v861_v58  ;;  %v230_v12 = vmul.f32 2.8102264e-08, %v864_v61  ;;  %v236_v13 = vadd.f32 3.4327394e-07, %v228_v62  ;;  %v242_v14 = vmul.f32 %v841_v44, %v234_v5 }
  0x53   :  { %v879_v15 = vadd.f32 -2.5, %v867_v6  ;;  %v231_v16 = vmul.f32 2.8102264e-08, %v870_v7  ;;  %v237_v17 = vadd.f32 3.4327394e-07, %v229_v9  ;;  %v243_v18 = vmul.f32 %v846_v48, %v235_v10 }
  0x54   :  { %v232_v19 = vmul.f32 2.8102264e-08, %v874_v11  ;;  %v238_v20 = vadd.f32 3.4327394e-07, %v230_v12  ;;  %v244_v21 = vmul.f32 %v852_v52, %v236_v13  ;;  %v250_v22 = vadd.f32 -3.5233877e-06, %v242_v14 }
  0x55   :  { %v233_v23 = vmul.f32 2.8102264e-08, %v879_v15  ;;  %v239_v24 = vadd.f32 3.4327394e-07, %v231_v16  ;;  %v245_v25 = vmul.f32 %v858_v56, %v237_v17  ;;  %v251_v26 = vadd.f32 -3.5233877e-06, %v243_v18 }
  0x56   :  { %v240_v27 = vadd.f32 3.4327394e-07, %v232_v19  ;;  %v246_v28 = vmul.f32 %v864_v61, %v238_v20  ;;  %v252_v29 = vadd.f32 -3.5233877e-06, %v244_v21  ;;  %v258_v30 = vmul.f32 %v841_v44, %v250_v22  ;;  %v889_v31 = vpop.eup %702 }
  0x57   :  { %v241_v32 = vadd.f32 3.4327394e-07, %v233_v23  ;;  %v247_v33 = vmul.f32 %v870_v7, %v239_v24  ;;  %v253_v34 = vadd.f32 -3.5233877e-06, %v245_v25  ;;  %v259_v35 = vmul.f32 %v846_v48, %v251_v26 }
  0x58   :  { %v248_v36 = vmul.f32 %v874_v11, %v240_v27  ;;  %v254_v38 = vadd.f32 -3.5233877e-06, %v246_v28  ;;  %v260_v39 = vmul.f32 %v852_v52, %v252_v29  ;;  %v266_v41 = vadd.f32 -4.3915065e-06, %v258_v30 }
  0x59   :  { %v249_v42 = vmul.f32 %v879_v15, %v241_v32  ;;  %v255_v45 = vadd.f32 -3.5233877e-06, %v247_v33  ;;  %v261_v46 = vmul.f32 %v858_v56, %v253_v34  ;;  %v267_v49 = vadd.f32 -4.3915065e-06, %v259_v35 }
  0x5a   :  { %v256_v50 = vadd.f32 -3.5233877e-06, %v248_v36  ;;  %v262_v53 = vmul.f32 %v864_v61, %v254_v38  ;;  %v268_v54 = vadd.f32 -4.3915065e-06, %v260_v39  ;;  %v274_v57 = vmul.f32 %v841_v44, %v266_v41 }
  0x5b   :  { %v257_v62 = vadd.f32 -3.5233877e-06, %v249_v42  ;;  %v263_v5 = vmul.f32 %v870_v7, %v255_v45  ;;  %v269_v9 = vadd.f32 -4.3915065e-06, %v261_v46  ;;  %v275_v10 = vmul.f32 %v846_v48, %v267_v49 }
  0x5c   :  { %v264_v12 = vmul.f32 %v874_v11, %v256_v50  ;;  %v270_v13 = vadd.f32 -4.3915065e-06, %v262_v53  ;;  %v276_v14 = vmul.f32 %v852_v52, %v268_v54  ;;  %v282_v16 = vadd.f32 0.00021858087, %v274_v57 }
  0x5d   :  { %v265_v17 = vmul.f32 %v879_v15, %v257_v62  ;;  %v271_v18 = vadd.f32 -4.3915065e-06, %v263_v5  ;;  %v277_v19 = vmul.f32 %v858_v56, %v269_v9  ;;  %v283_v20 = vadd.f32 0.00021858087, %v275_v10 }
  0x5e   :  { %v272_v21 = vadd.f32 -4.3915065e-06, %v264_v12  ;;  %v278_v22 = vmul.f32 %v864_v61, %v270_v13  ;;  %v284_v23 = vadd.f32 0.00021858087, %v276_v14  ;;  %v290_v24 = vmul.f32 %v841_v44, %v282_v16 }
  0x5f   :  { %v273_v25 = vadd.f32 -4.3915065e-06, %v265_v17  ;;  %v279_v26 = vmul.f32 %v870_v7, %v271_v18  ;;  %v285_v27 = vadd.f32 0.00021858087, %v277_v19  ;;  %v291_v28 = vmul.f32 %v846_v48, %v283_v20 }
  0x60   :  { %v280_v29 = vmul.f32 %v874_v11, %v272_v21  ;;  %v286_v30 = vadd.f32 0.00021858087, %v278_v22  ;;  %v292_v32 = vmul.f32 %v852_v52, %v284_v23  ;;  %v298_v33 = vadd.f32 -0.001253725, %v290_v24 }
  0x61   :  { %v281_v34 = vmul.f32 %v879_v15, %v273_v25  ;;  %v287_v35 = vadd.f32 0.00021858087, %v279_v26  ;;  %v293_v36 = vmul.f32 %v858_v56, %v285_v27  ;;  %v299_v38 = vadd.f32 -0.001253725, %v291_v28 }
  0x62   :  { %v288_v39 = vadd.f32 0.00021858087, %v280_v29  ;;  %v294_v41 = vmul.f32 %v864_v61, %v286_v30  ;;  %v300_v42 = vadd.f32 -0.001253725, %v292_v32  ;;  %v306_v45 = vmul.f32 %v841_v44, %v298_v33 }
  0x63   :  { %v289_v46 = vadd.f32 0.00021858087, %v281_v34  ;;  %v295_v49 = vmul.f32 %v870_v7, %v287_v35  ;;  %v301_v50 = vadd.f32 -0.001253725, %v293_v36  ;;  %v307_v53 = vmul.f32 %v846_v48, %v299_v38 }
  0x64   :  { %v296_v54 = vmul.f32 %v874_v11, %v288_v39  ;;  %v302_v57 = vadd.f32 -0.001253725, %v294_v41  ;;  %v308_v62 = vmul.f32 %v852_v52, %v300_v42  ;;  %v314_v5 = vadd.f32 -0.0041776816, %v306_v45 }
  0x65   :  { %v297_v9 = vmul.f32 %v879_v15, %v289_v46  ;;  %v303_v10 = vadd.f32 -0.001253725, %v295_v49  ;;  %v309_v12 = vmul.f32 %v858_v56, %v301_v50  ;;  %v315_v13 = vadd.f32 -0.0041776816, %v307_v53 }
  0x66   :  { %v304_v14 = vadd.f32 -0.001253725, %v296_v54  ;;  %v310_v16 = vmul.f32 %v864_v61, %v302_v57  ;;  %v316_v17 = vadd.f32 -0.0041776816, %v308_v62  ;;  %v322_v25 = vmul.f32 %v841_v44, %v314_v5 }
  0x67   :  { %v305_v18 = vadd.f32 -0.001253725, %v297_v9  ;;  %v311_v19 = vmul.f32 %v870_v7, %v303_v10  ;;  %v317_v20 = vadd.f32 -0.0041776816, %v309_v12  ;;  %v323_v26 = vmul.f32 %v846_v48, %v315_v13 }
  0x68   :  { %v312_v21 = vmul.f32 %v874_v11, %v304_v14  ;;  %v318_v22 = vadd.f32 -0.0041776816, %v310_v16  ;;  %v324_v28 = vmul.f32 %v852_v52, %v316_v17  ;;  %v330_v36 = vadd.f32 0.24664073, %v322_v25 }
  0x69   :  { %v313_v23 = vmul.f32 %v879_v15, %v305_v18  ;;  %v319_v24 = vadd.f32 -0.0041776816, %v311_v19  ;;  %v325_v29 = vmul.f32 %v858_v56, %v317_v20  ;;  %v331_v38 = vadd.f32 0.24664073, %v323_v26 }
  0x6a   :  { %v320_v27 = vadd.f32 -0.0041776816, %v312_v21  ;;  %v326_v30 = vmul.f32 %v864_v61, %v318_v22  ;;  %v332_v39 = vadd.f32 0.24664073, %v324_v28  ;;  %v355_v46 = vmul.f32 %v889_v31, %v834_v37 }
  0x6b   :  { %v321_v32 = vadd.f32 -0.0041776816, %v313_v23  ;;  %v327_v33 = vmul.f32 %v870_v7, %v319_v24  ;;  %v333_v41 = vadd.f32 0.24664073, %v325_v29  ;;  %v338_v53 = vmul.f32 %v841_v44, %v330_v36 }
  0x6c   :  { %v328_v34 = vmul.f32 %v874_v11, %v320_v27  ;;  %v334_v42 = vadd.f32 0.24664073, %v326_v30  ;;  %v339_v54 = vmul.f32 %v846_v48, %v331_v38  ;;  %704 = vrsqrt.f32 %v836_v40 }
  0x6d   :  { %v329_v35 = vmul.f32 %v879_v15, %v321_v32  ;;  %v335_v45 = vadd.f32 0.24664073, %v327_v33  ;;  %v340_v57 = vmul.f32 %v852_v52, %v332_v39  ;;  %v341_v62 = vmul.f32 %v858_v56, %v333_v41 }
  0x6e   :  { %v336_v49 = vadd.f32 0.24664073, %v328_v34  ;;  %v342_v5 = vmul.f32 %v864_v61, %v334_v42  ;;  %v359_v9 = vand.u32 2147483648, %v834_v37  ;;  %v357_v10 = vsel %vm356_vm0, %v834_v37, %v355_v46 }
  0x6f   :  { %v337_v50 = vadd.f32 0.24664073, %v329_v35  ;;  %v343_v31 = vmul.f32 %v870_v7, %v335_v45  ;;  %vm358_vm1 = vcmp.eq.f32.partialorder %v834_v37, 0.0  ;;  %706 = vrsqrt.f32 %v838_v43 }
  0x70   :  { %v344_v44 = vmul.f32 %v874_v11, %v336_v49  ;;  %708 = vrsqrt.f32 %v843_v47  ;;  %v950_v52 = vadd.f32 1.5014094, %v338_v53  ;;  %v767_v56 = vmov 1983009808  }
  0x71   :  { %v345_v48 = vmul.f32 %v879_v15, %v337_v50  ;;  %710 = vrsqrt.f32 %v849_v51  ;;  %v953_v61 = vunpack.c.l.s4 %v767_v56  ;;  %v955_v7 = vadd.f32 1.5014094, %v339_v54 }
  0x72   :  { %v957_v12 = vadd.f32 1.5014094, %v340_v57  ;;  %v360_v13 = vsel %vm358_vm1, %v359_v9, %v357_v10  ;;  %712 = vrsqrt.f32 %v855_v55  ;;  %v960_v14 = vadd.f32 1.5014094, %v341_v62 }
  0x73   :  { %v962_v11 = vadd.f32 1.5014094, %v342_v5  ;;  %v964_v16 = vadd.f32 1.5014094, %v343_v31  ;;  %714 = vrsqrt.f32 %v861_v58  ;;  %v967_v15 = vadd.f32 1.5014094, %v344_v44 }
  0x74   :  { %vm363_vm2 = vcmp.eq.f32.partialorder %v836_v40, inf  ;;  %vm365_vm3 = vcmp.eq.f32.partialorder %v836_v40, 0.0  ;;  %716 = vrsqrt.f32 %v867_v6  ;;  %v972_v17 = vadd.f32 1.5014094, %v345_v48 }
  0x75   :  { %v366_v18 = vand.u32 2147483648, %v836_v40  ;;  %vm370_vm4 = vcmp.eq.f32.partialorder %v838_v43, inf  ;;  %v976_v19 = vadd.f32 -3.0, %v360_v13  ;;  %vm372_vm5 = vcmp.eq.f32.partialorder %v838_v43, 0.0 }
  0x76   :  { %v373_v20 = vand.u32 2147483648, %v838_v43  ;;  %vm377_vm6 = vcmp.eq.f32.partialorder %v843_v47, inf  ;;  %vm379_vm7 = vcmp.eq.f32.partialorder %v843_v47, 0.0  ;;  %v705_v21 = vpop.eup %704  ;;  %v380_v22 = vand.u32 2147483648, %v843_v47 }
  0x77   :  { %vm384_vm8 = vcmp.eq.f32.partialorder %v849_v51, inf  ;;  %vm386_vm9 = vcmp.eq.f32.partialorder %v849_v51, 0.0  ;;  %v418_v23 = vmul.f32 -0.00020021426, %v976_v19  ;;  %v362_v24 = vmul.f32 %v705_v21, %v836_v40 }
  0x78   :  { %v387_v25 = vand.u32 2147483648, %v849_v51  ;;  %vm391_vm10 = vcmp.eq.f32.partialorder %v855_v55, inf  ;;  %vm393_vm11 = vcmp.eq.f32.partialorder %v855_v55, 0.0  ;;  %v394_v27 = vand.u32 2147483648, %v855_v55 }
  0x79   :  { %v707_v26 = vpop.eup %706  ;;  %vm398_vm12 = vcmp.eq.f32.partialorder %v861_v58, inf  ;;  %vm400_vm13 = vcmp.eq.f32.partialorder %v861_v58, 0.0  ;;  %v426_v28 = vadd.f32 0.00010095056, %v418_v23  ;;  %v364_v30 = vsel %vm363_vm2, %v836_v40, %v362_v24 }
  0x7a   :  { %v709_v29 = vpop.eup %708  ;;  %v369_v32 = vmul.f32 %v707_v26, %v838_v43  ;;  %v401_v33 = vand.u32 2147483648, %v861_v58  ;;  %vm405_vm14 = vcmp.eq.f32.partialorder %v867_v6, inf  ;;  %v367_v35 = vsel %vm365_vm3, %v366_v18, %v364_v30 }
  0x7b   :  { %v711_v34 = vpop.eup %710  ;;  %v376_v36 = vmul.f32 %v709_v29, %v843_v47  ;;  %vm407_vm15 = vcmp.eq.f32.partialorder %v867_v6, 0.0  ;;  %v434_v38 = vmul.f32 %v976_v19, %v426_v28  ;;  %v408_v45 = vand.u32 2147483648, %v867_v6 }
  0x7c   :  { %v713_v39 = vpop.eup %712  ;;  %v371_v41 = vsel %vm370_vm4, %v838_v43, %v369_v32  ;;  %v383_v42 = vmul.f32 %v711_v34, %v849_v51  ;;  %v1009_v46 = vadd.f32 -3.0, %v367_v35  ;;  %vm546_vm0 = vcmp.lt.f32.partialorder %v834_v37, 5.0 }
  0x7d   :  { %v715_v49 = vpop.eup %714  ;;  %v374_v50 = vsel %vm372_vm5, %v373_v20, %v371_v41  ;;  %v378_v53 = vsel %vm377_vm6, %v843_v47, %v376_v36  ;;  %v390_v54 = vmul.f32 %v713_v39, %v855_v55  ;;  %v442_v57 = vadd.f32 0.0013493432, %v434_v38 }
  0x7e   :  { %v717_v62 = vpop.eup %716  ;;  %v381_v5 = vsel %vm379_vm7, %v380_v22, %v378_v53  ;;  %v385_v9 = vsel %vm384_vm8, %v849_v51, %v383_v42  ;;  %v397_v31 = vmul.f32 %v715_v49, %v861_v58  ;;  %v1023_v10 = vadd.f32 -3.0, %v374_v50 }
  0x7f   :  { %v388_v44 = vsel %vm386_vm9, %v387_v25, %v385_v9  ;;  %v392_v48 = vsel %vm391_vm10, %v855_v55, %v390_v54  ;;  %v404_v56 = vmul.f32 %v717_v62, %v867_v6  ;;  %v1031_v13 = vadd.f32 -3.0, %v381_v5 }
  0x80   :  { %v395_v18 = vsel %vm393_vm11, %v394_v27, %v392_v48  ;;  %v399_v20 = vsel %vm398_vm12, %v861_v58, %v397_v31  ;;  %v1038_v21 = vadd.f32 -3.0, %v388_v44  ;;  %v419_v22 = vmul.f32 -0.00020021426, %v1009_v46 }
  0x81   :  { %v402_v23 = vsel %vm400_vm13, %v401_v33, %v399_v20  ;;  %v406_v24 = vsel %vm405_vm14, %v867_v6, %v404_v56  ;;  %v1046_v25 = vadd.f32 -3.0, %v395_v18  ;;  %v420_v26 = vmul.f32 -0.00020021426, %v1023_v10 }
  0x82   :  { %v409_v27 = vsel %vm407_vm15, %v408_v45, %v406_v24  ;;  %v1051_v28 = vadd.f32 -3.0, %v402_v23  ;;  %v421_v29 = vmul.f32 -0.00020021426, %v1031_v13  ;;  %v422_v30 = vmul.f32 -0.00020021426, %v1038_v21 }
  0x83   :  { %v1055_v32 = vadd.f32 -3.0, %v409_v27  ;;  %v423_v33 = vmul.f32 -0.00020021426, %v1046_v25  ;;  %v427_v34 = vadd.f32 0.00010095056, %v419_v22  ;;  %v450_v35 = vmul.f32 %v976_v19, %v442_v57 }
  0x84   :  { %v424_v36 = vmul.f32 -0.00020021426, %v1051_v28  ;;  %v428_v38 = vadd.f32 0.00010095056, %v420_v26  ;;  %v429_v39 = vadd.f32 0.00010095056, %v421_v29  ;;  %v608_v41 = vunpack.c.0.s8 %v953_v61 }
  0x85   :  { %v425_v42 = vmul.f32 -0.00020021426, %v1055_v32  ;;  %v430_v45 = vadd.f32 0.00010095056, %v422_v30  ;;  %v431_v49 = vadd.f32 0.00010095056, %v423_v33  ;;  %v435_v50 = vmul.f32 %v1009_v46, %v427_v34 }
  0x86   :  { %v432_v53 = vadd.f32 0.00010095056, %v424_v36  ;;  %v436_v54 = vmul.f32 %v1023_v10, %v428_v38  ;;  %v437_v62 = vmul.f32 %v1031_v13, %v429_v39  ;;  %v458_v5 = vadd.f32 -0.0036734284, %v450_v35  ;;  %v579_v61 = vld [vmem:[#allocation3 + $0x8] sm:$0xff] }
  0x87   :  { %v433_v9 = vadd.f32 0.00010095056, %v425_v42  ;;  %v438_v57 = vmul.f32 %v1038_v21, %v430_v45  ;;  %v439_v31 = vmul.f32 %v1046_v25, %v431_v49  ;;  %v443_v44 = vadd.f32 0.0013493432, %v435_v50 }
  0x88   :  { %v440_v48 = vmul.f32 %v1051_v28, %v432_v53  ;;  %v444_v56 = vadd.f32 0.0013493432, %v436_v54  ;;  %v445_v18 = vadd.f32 0.0013493432, %v437_v62  ;;  %v466_v20 = vmul.f32 %v976_v19, %v458_v5 }
  0x89   :  { %v441_v22 = vmul.f32 %v1055_v32, %v433_v9  ;;  %v446_v23 = vadd.f32 0.0013493432, %v438_v57  ;;  %v447_v24 = vadd.f32 0.0013493432, %v439_v31  ;;  %v451_v26 = vmul.f32 %v1009_v46, %v443_v44 }
  0x8a   :  { %v448_v27 = vadd.f32 0.0013493432, %v440_v48  ;;  %v452_v29 = vmul.f32 %v1023_v10, %v444_v56  ;;  %v453_v30 = vmul.f32 %v1031_v13, %v445_v18  ;;  %v474_v33 = vadd.f32 0.0057395077, %v466_v20 }
  0x8b   :  { %v449_v34 = vadd.f32 0.0013493432, %v441_v22  ;;  %v454_v35 = vmul.f32 %v1038_v21, %v446_v23  ;;  %v455_v36 = vmul.f32 %v1046_v25, %v447_v24  ;;  %v459_v38 = vadd.f32 -0.0036734284, %v451_v26 }
  0x8c   :  { %v456_v39 = vmul.f32 %v1051_v28, %v448_v27  ;;  %v460_v42 = vadd.f32 -0.0036734284, %v452_v29  ;;  %v461_v45 = vadd.f32 -0.0036734284, %v453_v30  ;;  %v482_v49 = vmul.f32 %v976_v19, %v474_v33 }
  0x8d   :  { %v457_v50 = vmul.f32 %v1055_v32, %v449_v34  ;;  %v462_v53 = vadd.f32 -0.0036734284, %v454_v35  ;;  %v463_v54 = vadd.f32 -0.0036734284, %v455_v36  ;;  %v467_v62 = vmul.f32 %v1009_v46, %v459_v38 }
  0x8e   :  { %v464_v5 = vadd.f32 -0.0036734284, %v456_v39  ;;  %v468_v9 = vmul.f32 %v1023_v10, %v460_v42  ;;  %v469_v57 = vmul.f32 %v1031_v13, %v461_v45  ;;  %v490_v31 = vadd.f32 -0.0076224613, %v482_v49 }
  0x8f   :  { %v465_v44 = vadd.f32 -0.0036734284, %v457_v50  ;;  %v470_v48 = vmul.f32 %v1038_v21, %v462_v53  ;;  %v471_v56 = vmul.f32 %v1046_v25, %v463_v54  ;;  %v475_v18 = vadd.f32 0.0057395077, %v467_v62 }
  0x90   :  { %v472_v20 = vmul.f32 %v1051_v28, %v464_v5  ;;  %v476_v22 = vadd.f32 0.0057395077, %v468_v9  ;;  %v477_v23 = vadd.f32 0.0057395077, %v469_v57  ;;  %v498_v24 = vmul.f32 %v976_v19, %v490_v31 }
  0x91   :  { %v473_v26 = vmul.f32 %v1055_v32, %v465_v44  ;;  %v478_v27 = vadd.f32 0.0057395077, %v470_v48  ;;  %v479_v29 = vadd.f32 0.0057395077, %v471_v56  ;;  %v483_v30 = vmul.f32 %v1009_v46, %v475_v18 }
  0x92   :  { %v480_v33 = vadd.f32 0.0057395077, %v472_v20  ;;  %v484_v34 = vmul.f32 %v1023_v10, %v476_v22  ;;  %v485_v35 = vmul.f32 %v1031_v13, %v477_v23  ;;  %v506_v36 = vadd.f32 0.0094388705, %v498_v24 }
  0x93   :  { %v481_v38 = vadd.f32 0.0057395077, %v473_v26  ;;  %v486_v39 = vmul.f32 %v1038_v21, %v478_v27  ;;  %v487_v42 = vmul.f32 %v1046_v25, %v479_v29  ;;  %v491_v45 = vadd.f32 -0.0076224613, %v483_v30 }
  0x94   :  { %v488_v49 = vmul.f32 %v1051_v28, %v480_v33  ;;  %v492_v50 = vadd.f32 -0.0076224613, %v484_v34  ;;  %v493_v53 = vadd.f32 -0.0076224613, %v485_v35  ;;  %v514_v54 = vmul.f32 %v976_v19, %v506_v36 }
  0x95   :  { %v489_v62 = vmul.f32 %v1055_v32, %v481_v38  ;;  %v494_v5 = vadd.f32 -0.0076224613, %v486_v39  ;;  %v495_v9 = vadd.f32 -0.0076224613, %v487_v42  ;;  %v499_v57 = vmul.f32 %v1009_v46, %v491_v45 }
  0x96   :  { %v496_v31 = vadd.f32 -0.0076224613, %v488_v49  ;;  %v500_v44 = vmul.f32 %v1023_v10, %v492_v50  ;;  %v501_v48 = vmul.f32 %v1031_v13, %v493_v53  ;;  %v522_v56 = vadd.f32 1.001674, %v514_v54 }
  0x97   :  { %vm547_vm1 = vcmp.lt.f32.partialorder %v836_v40, 5.0  ;;  %v497_v18 = vadd.f32 -0.0076224613, %v489_v62  ;;  %v502_v20 = vmul.f32 %v1038_v21, %v494_v5  ;;  %v503_v22 = vmul.f32 %v1046_v25, %v495_v9 }
  0x98   :  { %v507_v23 = vadd.f32 0.0094388705, %v499_v57  ;;  %vm548_vm2 = vcmp.lt.f32.partialorder %v838_v43, 5.0  ;;  %vm549_vm3 = vcmp.lt.f32.partialorder %v843_v47, 5.0  ;;  %v504_v24 = vmul.f32 %v1051_v28, %v496_v31 }
  0x99   :  { %v508_v26 = vadd.f32 0.0094388705, %v500_v44  ;;  %v509_v27 = vadd.f32 0.0094388705, %v501_v48  ;;  %v530_v29 = vmul.f32 %v976_v19, %v522_v56  ;;  %vm550_vm4 = vcmp.lt.f32.partialorder %v849_v51, 5.0 }
  0x9a   :  { %vm551_vm5 = vcmp.lt.f32.partialorder %v855_v55, 5.0  ;;  %v505_v30 = vmul.f32 %v1055_v32, %v497_v18  ;;  %v510_v33 = vadd.f32 0.0094388705, %v502_v20  ;;  %v511_v34 = vadd.f32 0.0094388705, %v503_v22 }
  0x9b   :  { %v515_v35 = vmul.f32 %v1009_v46, %v507_v23  ;;  %vm552_vm6 = vcmp.lt.f32.partialorder %v861_v58, 5.0  ;;  %v512_v36 = vadd.f32 0.0094388705, %v504_v24  ;;  %v516_v38 = vmul.f32 %v1023_v10, %v508_v26 }
  0x9c   :  { %v517_v39 = vmul.f32 %v1031_v13, %v509_v27  ;;  %v538_v42 = vadd.f32 2.8329768, %v530_v29  ;;  %vm553_vm7 = vcmp.lt.f32.partialorder %v867_v6, 5.0  ;;  %v513_v19 = vadd.f32 0.0094388705, %v505_v30 }
  0x9d   :  { %v518_v45 = vmul.f32 %v1038_v21, %v510_v33  ;;  %v519_v49 = vmul.f32 %v1046_v25, %v511_v34  ;;  %v523_v50 = vadd.f32 1.001674, %v515_v35  ;;  %v520_v53 = vmul.f32 %v1051_v28, %v512_v36 }
  0x9e   :  { %v524_v54 = vadd.f32 1.001674, %v516_v38  ;;  %v525_v62 = vadd.f32 1.001674, %v517_v39  ;;  %v554_v5 = vsel %vm546_vm0, %v950_v52, %v538_v42  ;;  %v521_v9 = vmul.f32 %v1055_v32, %v513_v19 }
  0x9f   :  { %v526_v57 = vadd.f32 1.001674, %v518_v45  ;;  %v527_v31 = vadd.f32 1.001674, %v519_v49  ;;  %v531_v44 = vmul.f32 %v1009_v46, %v523_v50  ;;  %v528_v48 = vadd.f32 1.001674, %v520_v53 }
  0xa0   :  { %v532_v56 = vmul.f32 %v1023_v10, %v524_v54  ;;  %v533_v18 = vmul.f32 %v1031_v13, %v525_v62  ;;  %v562_v20 = vmul.f32 %v554_v5, %v802_v59  ;;  %v529_v22 = vadd.f32 1.001674, %v521_v9 }
  0xa1   :  { %v534_v23 = vmul.f32 %v1038_v21, %v526_v57  ;;  %v535_v24 = vmul.f32 %v1046_v25, %v527_v31  ;;  %v539_v37 = vadd.f32 2.8329768, %v531_v44  ;;  %v536_v52 = vmul.f32 %v1051_v28, %v528_v48 }
  0xa2   :  { %v540_v26 = vadd.f32 2.8329768, %v532_v56  ;;  %v541_v27 = vadd.f32 2.8329768, %v533_v18  ;;  %v570_v29 = vmul.f32 1.4142135, %v562_v20  ;;  %v537_v46 = vmul.f32 %v1055_v32, %v529_v22 }
  0xa3   :  { %v542_v30 = vadd.f32 2.8329768, %v534_v23  ;;  %v543_v33 = vadd.f32 2.8329768, %v535_v24  ;;  %v555_v10 = vsel %vm547_vm1, %v955_v7, %v539_v37  ;;  %v544_v59 = vadd.f32 2.8329768, %v536_v52 }
  0xa4   :  { %v556_v13 = vsel %vm548_vm2, %v957_v12, %v540_v26  ;;  %v557_v21 = vsel %vm549_vm3, %v960_v14, %v541_v27  ;;  %v563_v25 = vmul.f32 %v555_v10, %v804_v60  ;;  %v545_v28 = vadd.f32 2.8329768, %v537_v46  ;;  %v578_v56 = vld [vmem:[#allocation3] sm:$0xff] }
  0xa5   :  { %v558_v32 = vsel %vm550_vm4, %v962_v11, %v542_v30  ;;  %v559_v40 = vsel %vm551_vm5, %v964_v16, %v543_v33  ;;  %v564_v7 = vmul.f32 %v556_v13, %v806_v63  ;;  %v560_v43 = vsel %vm552_vm6, %v967_v15, %v544_v59 }
  0xa6   :  { %v565_v47 = vmul.f32 %v557_v21, %v808_v0  ;;  %v566_v12 = vmul.f32 %v558_v32, %v810_v2  ;;  %v567_v60 = vmul.f32 %v559_v40, %v812_v3  ;;  %v561_v51 = vsel %vm553_vm7, %v972_v17, %v545_v28 }
  0xa7   :  { %v568_v14 = vmul.f32 %v560_v43, %v814_v4  ;;  %v571_v55 = vmul.f32 1.4142135, %v563_v25  ;;  %v572_v11 = vmul.f32 1.4142135, %v564_v7  ;;  %v569_v63 = vmul.f32 %v561_v51, %v819_v8 }
  0xa8   :  { %v573_v16 = vmul.f32 1.4142135, %v565_v47  ;;  %v574_v34 = vmul.f32 1.4142135, %v566_v12  ;;  %v575_v58 = vmul.f32 1.4142135, %v567_v60  ;;  %v611_v4 = vsub.s32 %v608_v41, %v796_v1 }
  0xa9   :  { %v576_v15 = vmul.f32 1.4142135, %v568_v14  ;;  %v580_v35 = vmul.f32 0.1, %v570_v29  ;;  %v581_v0 = vmul.f32 0.1, %v571_v55 }
  0xaa   :  { %v577_v36 = vmul.f32 1.4142135, %v569_v63  ;;  %v582_v2 = vmul.f32 0.1, %v572_v11  ;;  %v583_v38 = vmul.f32 0.1, %v573_v16 }
  0xab   :  { %v584_v3 = vmul.f32 0.1, %v574_v34  ;;  %v585_v39 = vmul.f32 0.1, %v575_v58  ;;  %v586_v42 = vmul.f32 0.1, %v576_v15 }
  0xac   :  { %v587_v6 = vmul.f32 0.1, %v577_v36  ;;  %v588_v17 = vadd.f32 1.0, %v580_v35  ;;  %v589_v19 = vadd.f32 1.0, %v581_v0  ;;  %v590_v8 = vadd.f32 1.0, %v582_v2 }
  0xad   :  { %v591_v45 = vadd.f32 1.0, %v583_v38  ;;  %v592_v49 = vadd.f32 1.0, %v584_v3  ;;  %v593_v50 = vadd.f32 1.0, %v585_v39  ;;  %v594_v53 = vadd.f32 1.0, %v586_v42 }
  0xae   :  { %v595_v54 = vadd.f32 1.0, %v587_v6  ;;  %v604_v62 = vcombine.low %v588_v17, %v589_v19 }
  0xaf   :  { %v605_v5 = vcombine.low %v590_v8, %v591_v45  ;;  %v621_v9 = vcombine.low %v592_v49, %v593_v50 }
  0xb0   :  { %v612_v57 = vrot.slane %v604_v62, %v611_v4  ;;  %v622_v31 = vcombine.low %v594_v53, %v595_v54 }
  0xb1   :  { %v619_v44 = vrot.slane %v605_v5, %v611_v4  ;;  %v629_v48 = vrot.slane %v621_v9, %v611_v4 }
  0xb2   :  { %v636_v18 = vrot.slane %v622_v31, %v611_v4 }
  0xb3   :  { %v620_v1 = vcombine.low %v612_v57, %v619_v44 }
  0xb4   :  { %v637_v41 = vcombine.low %v629_v48, %v636_v18 }
  0xb5   :  { %v640_v20 = vmul.f32 %v620_v1, %v578_v56 }
  0xb6   :  { %v641_v22 = vmul.f32 %v637_v41, %v579_v61 }
  0xb7   :  { %642 = vst [vmem:[#allocation6] sm:$0xff] %v640_v20 }
  0xb8   :  { %643 = vst [vmem:[#allocation6 + $0x8] sm:$0xff] %v641_v22 }
  0xb9   :  { %751 = shalt.err (!%p748_p12)
}
  0xba   :  { %s752_s26 = scalar_lea.hbm %s1173_s2, 256 }
  0xbb   :  { %p753_p13 = scmp.ne.s32.totalorder %s1173_s2, %s752_s26  ;;  %p756_p0 = scmp.lt.u32.totalorder %s752_s26, %s1173_s2 }
  0xbd   :  { %p758_p1 = pnand %p756_p0, %p753_p13 }
  0xbf   :  { %761 = shalt.err (!%p758_p1)
}
  0xc0   :  { %653 = dma.vmem_to_hbm [thread:$0]  %s651_s1, 256, %s1173_s2, [#allocation5]  }
  0xc1   :  { %764 = dma.done.wait [#allocation5], 256  }
  0xc2   :  { %765 = vsyncadd [#allocation5], 4294967040 }
  0xc3   :  { %657 = vsyncpa [#allocation4], 1 }
  0xc4   :  { %658 = vsyncpa [#allocation5], 1 }

</bundles_post_ra>
